<compile_context>
chip_gen: v6e
topology: v6e:2x2x1
jax: 0.10.0
libtpu: 0.0.40
codegen_flags: <defaults>
</compile_context>

<pallas_src>
import math

import jax
import jax.numpy as jnp
from jax import lax
from jax.experimental import pallas as pl
from jax.experimental.pallas import tpu as pltpu

# ---- problem sizes (small, consistent with the module's forward) -------------
B = 2          # batch
S = 8          # sequence length
NH = 4         # number_of_heads
DH = 8         # head_dimension
D = NH * DH    # model dimension = 32

_NEG = -1e30                      # stand-in for float('-inf') in masked_fill
_SCALE = 1.0 / math.sqrt(DH)


# ---- Pallas kernel: fused per-(batch, head) attention -------------------------
def _attention_kernel(q_ref, k_ref, v_ref, m_ref,
                      wq_ref, wk_ref, wv_ref,
                      bq_ref, bk_ref, bv_ref,
                      o_ref):
    # blocks: q/k/v (1,S,D); mask (1,1,S); w* (1,D,DH); b* (1,1,DH); out (1,1,S,DH)
    xq = q_ref[0]                                            # (S, D)
    xk = k_ref[0]
    xv = v_ref[0]

    # fused Linear projections for this head: x @ W_h + b_h -> (S, DH)
    q = jnp.dot(xq, wq_ref[0], preferred_element_type=jnp.float32) + bq_ref[0]
    k = jnp.dot(xk, wk_ref[0], preferred_element_type=jnp.float32) + bk_ref[0]
    v = jnp.dot(xv, wv_ref[0], preferred_element_type=jnp.float32) + bv_ref[0]

    # scaled dot-product scores (contract over head dim, no explicit transpose)
    scores = lax.dot_general(q, k, (((1,), (1,)), ((), ())),
                             preferred_element_type=jnp.float32) * _SCALE  # (S, S)

    # masked_fill(mask == False, -inf); mask broadcasts over query positions
    m = m_ref[0]                                             # (1, S)
    scores = jnp.where(m > 0.0, scores, _NEG)

    # numerically stable softmax along the key axis
    scores = scores - jnp.max(scores, axis=-1, keepdims=True)
    e = jnp.exp(scores)
    attn = e / jnp.sum(e, axis=-1, keepdims=True)

    # TODO(synk): attention_dropout (train mode) and log_attention_weights side
    # effect are omitted; eval-mode dropout is the identity.

    o_ref[0, 0] = jnp.dot(attn, v, preferred_element_type=jnp.float32)  # (S, DH)


# ---- Attention.forward ---------------------------------------------------------
def attention_forward(query, key, value, mask, params):
    """query/key/value: (B, S, D) f32; mask: (B, 1, 1, S) bool -> (B, NH, S, DH)."""
    wq, bq, wk, bk, wv, bv = params

    # per-head weight layout: (D, D) -> (NH, D, DH); bias (D,) -> (NH, 1, DH)
    def split_w(w):
        return jnp.transpose(w.reshape(D, NH, DH), (1, 0, 2))

    def split_b(b):
        return b.reshape(NH, 1, DH)

    wq_h, wk_h, wv_h = split_w(wq), split_w(wk), split_w(wv)
    bq_h, bk_h, bv_h = split_b(bq), split_b(bk), split_b(bv)

    # (B, 1, 1, S) bool -> (B, 1, S) f32 ; broadcast to (S, S) happens in-kernel
    m = mask.reshape(B, 1, S).astype(jnp.float32)

    flops = B * NH * (3 * 2 * S * D * DH + 2 * 2 * S * S * DH)
    bytes_accessed = 4 * (3 * B * S * D + 3 * D * D + 3 * D + B * S + B * NH * S * DH)
    cost = pl.CostEstimate(flops=flops,
                           transcendentals=B * NH * S * S,
                           bytes_accessed=bytes_accessed)

    qkv_spec = pl.BlockSpec((1, S, D), lambda b, h: (b, 0, 0))
    w_spec = pl.BlockSpec((1, D, DH), lambda b, h: (h, 0, 0))
    b_spec = pl.BlockSpec((1, 1, DH), lambda b, h: (h, 0, 0))
    m_spec = pl.BlockSpec((1, 1, S), lambda b, h: (b, 0, 0))

    return pl.pallas_call(
        _attention_kernel,
        out_shape=jax.ShapeDtypeStruct((B, NH, S, DH), jnp.float32),
        grid=(B, NH),
        in_specs=[qkv_spec, qkv_spec, qkv_spec, m_spec,
                  w_spec, w_spec, w_spec,
                  b_spec, b_spec, b_spec],
        out_specs=pl.BlockSpec((1, 1, S, DH), lambda b, h: (b, h, 0, 0)),
        compiler_params=pltpu.CompilerParams(
            dimension_semantics=("parallel", "parallel")),
        cost_estimate=cost,
    )(query, key, value, m, wq_h, wk_h, wv_h, bq_h, bk_h, bv_h)


# ---- pure-JAX reference (mirrors the PyTorch forward) --------------------------
def reference(query, key, value, mask, params):
    wq, bq, wk, bk, wv, bv = params

    def proj(x, w, b):
        y = x @ w + b                                               # (B, S, D)
        return jnp.transpose(y.reshape(B, S, NH, DH), (0, 2, 1, 3))  # (B, NH, S, DH)

    q, k, v = proj(query, wq, bq), proj(key, wk, bk), proj(value, wv, bv)
    scores = jnp.einsum('bhqd,bhkd->bhqk', q, k) * _SCALE
    scores = jnp.where(mask, scores, _NEG)                          # (B,1,1,S) broadcasts
    attn = jax.nn.softmax(scores, axis=-1)
    return jnp.einsum('bhqk,bhkd->bhqd', attn, v)


if __name__ == "__main__":
    key0 = jax.random.PRNGKey(0)
    ks = jax.random.split(key0, 9)

    query = jax.random.normal(ks[0], (B, S, D), dtype=jnp.float32)
    key_in = jax.random.normal(ks[1], (B, S, D), dtype=jnp.float32)
    value = jax.random.normal(ks[2], (B, S, D), dtype=jnp.float32)

    # padding mask: all tokens valid for batch 0, last two masked for batch 1
    lengths = jnp.array([S, S - 2])
    mask = (jnp.arange(S)[None, :] < lengths[:, None])[:, None, None, :]  # (B,1,1,S) bool

    w_scale = 1.0 / math.sqrt(D)
    wq = jax.random.normal(ks[3], (D, D), dtype=jnp.float32) * w_scale
    wk = jax.random.normal(ks[4], (D, D), dtype=jnp.float32) * w_scale
    wv = jax.random.normal(ks[5], (D, D), dtype=jnp.float32) * w_scale
    bq = jax.random.normal(ks[6], (D,), dtype=jnp.float32) * 0.02
    bk = jax.random.normal(ks[7], (D,), dtype=jnp.float32) * 0.02
    bv = jax.random.normal(ks[8], (D,), dtype=jnp.float32) * 0.02
    params = (wq, bq, wk, bk, wv, bv)

    out = jax.block_until_ready(attention_forward(query, key_in, value, mask, params))
    ref = jax.block_until_ready(reference(query, key_in, value, mask, params))

    assert out.shape == (B, NH, S, DH)
    assert jnp.allclose(out, ref, atol=1e-4, rtol=1e-4), float(jnp.max(jnp.abs(out - ref)))

    print("KERNEL_OK")
</pallas_src>

<mosaic_0001>
module attributes {stable_mosaic.version = 11 : i64} {
  func.func @_attention_kernel(%arg0: i32, %arg1: i32, %arg2: memref<1x8x32xf32, #tpu.memory_space<vmem>>, %arg3: memref<1x8x32xf32, #tpu.memory_space<vmem>>, %arg4: memref<1x8x32xf32, #tpu.memory_space<vmem>>, %arg5: memref<1x1x8xf32, #tpu.memory_space<vmem>>, %arg6: memref<1x32x8xf32, #tpu.memory_space<vmem>>, %arg7: memref<1x32x8xf32, #tpu.memory_space<vmem>>, %arg8: memref<1x32x8xf32, #tpu.memory_space<vmem>>, %arg9: memref<1x1x8xf32, #tpu.memory_space<vmem>>, %arg10: memref<1x1x8xf32, #tpu.memory_space<vmem>>, %arg11: memref<1x1x8xf32, #tpu.memory_space<vmem>>, %arg12: memref<1x1x8x8xf32, #tpu.memory_space<vmem>>) attributes {dimension_semantics = [#tpu.dimension_semantics<parallel>, #tpu.dimension_semantics<parallel>], iteration_bounds = array<i64: 2, 4>, scalar_prefetch = 0 : i64, scratch_operands = 0 : i64, tpu.core_type = #tpu.core_type<tc>, window_params = [{transform_indices = @transform_0, window_bounds = array<i64: 1, 8, 32>}, {transform_indices = @transform_1, window_bounds = array<i64: 1, 8, 32>}, {transform_indices = @transform_2, window_bounds = array<i64: 1, 8, 32>}, {transform_indices = @transform_3, window_bounds = array<i64: 1, 1, 8>}, {transform_indices = @transform_4, window_bounds = array<i64: 1, 32, 8>}, {transform_indices = @transform_5, window_bounds = array<i64: 1, 32, 8>}, {transform_indices = @transform_6, window_bounds = array<i64: 1, 32, 8>}, {transform_indices = @transform_7, window_bounds = array<i64: 1, 1, 8>}, {transform_indices = @transform_8, window_bounds = array<i64: 1, 1, 8>}, {transform_indices = @transform_9, window_bounds = array<i64: 1, 1, 8>}, {transform_indices = @transform_10, window_bounds = array<i64: 1, 1, 8, 8>}]} {
    %c0 = arith.constant 0 : index
    %c0_0 = arith.constant 0 : index
    %c0_1 = arith.constant 0 : index
    %0 = vector.load %arg2[%c0, %c0_0, %c0_1] : memref<1x8x32xf32, #tpu.memory_space<vmem>>, vector<1x8x32xf32>
    %1 = vector.shape_cast %0 : vector<1x8x32xf32> to vector<8x32xf32>
    %c0_2 = arith.constant 0 : index
    %c0_3 = arith.constant 0 : index
    %c0_4 = arith.constant 0 : index
    %2 = vector.load %arg3[%c0_2, %c0_3, %c0_4] : memref<1x8x32xf32, #tpu.memory_space<vmem>>, vector<1x8x32xf32>
    %3 = vector.shape_cast %2 : vector<1x8x32xf32> to vector<8x32xf32>
    %c0_5 = arith.constant 0 : index
    %c0_6 = arith.constant 0 : index
    %c0_7 = arith.constant 0 : index
    %4 = vector.load %arg4[%c0_5, %c0_6, %c0_7] : memref<1x8x32xf32, #tpu.memory_space<vmem>>, vector<1x8x32xf32>
    %5 = vector.shape_cast %4 : vector<1x8x32xf32> to vector<8x32xf32>
    %c0_8 = arith.constant 0 : index
    %c0_9 = arith.constant 0 : index
    %c0_10 = arith.constant 0 : index
    %6 = vector.load %arg6[%c0_8, %c0_9, %c0_10] : memref<1x32x8xf32, #tpu.memory_space<vmem>>, vector<1x32x8xf32>
    %7 = vector.shape_cast %6 : vector<1x32x8xf32> to vector<32x8xf32>
    %cst = arith.constant dense<0.000000e+00> : vector<8x8xf32>
    %8 = tpu.matmul %1, %7, %cst {dimension_numbers = #tpu.dot_dimension_numbers<[1], [0], [0], [1], [0, 0, 1, 1], [], []>} : vector<8x32xf32>, vector<32x8xf32>, vector<8x8xf32> -> vector<8x8xf32>
    %c0_11 = arith.constant 0 : index
    %c0_12 = arith.constant 0 : index
    %c0_13 = arith.constant 0 : index
    %9 = vector.load %arg9[%c0_11, %c0_12, %c0_13] : memref<1x1x8xf32, #tpu.memory_space<vmem>>, vector<1x1x8xf32>
    %10 = vector.shape_cast %9 : vector<1x1x8xf32> to vector<1x8xf32>
    %11 = vector.broadcast %10 : vector<1x8xf32> to vector<8x8xf32>
    %12 = arith.addf %8, %11 : vector<8x8xf32>
    %c0_14 = arith.constant 0 : index
    %c0_15 = arith.constant 0 : index
    %c0_16 = arith.constant 0 : index
    %13 = vector.load %arg7[%c0_14, %c0_15, %c0_16] : memref<1x32x8xf32, #tpu.memory_space<vmem>>, vector<1x32x8xf32>
    %14 = vector.shape_cast %13 : vector<1x32x8xf32> to vector<32x8xf32>
    %cst_17 = arith.constant dense<0.000000e+00> : vector<8x8xf32>
    %15 = tpu.matmul %3, %14, %cst_17 {dimension_numbers = #tpu.dot_dimension_numbers<[1], [0], [0], [1], [0, 0, 1, 1], [], []>} : vector<8x32xf32>, vector<32x8xf32>, vector<8x8xf32> -> vector<8x8xf32>
    %c0_18 = arith.constant 0 : index
    %c0_19 = arith.constant 0 : index
    %c0_20 = arith.constant 0 : index
    %16 = vector.load %arg10[%c0_18, %c0_19, %c0_20] : memref<1x1x8xf32, #tpu.memory_space<vmem>>, vector<1x1x8xf32>
    %17 = vector.shape_cast %16 : vector<1x1x8xf32> to vector<1x8xf32>
    %18 = vector.broadcast %17 : vector<1x8xf32> to vector<8x8xf32>
    %19 = arith.addf %15, %18 : vector<8x8xf32>
    %c0_21 = arith.constant 0 : index
    %c0_22 = arith.constant 0 : index
    %c0_23 = arith.constant 0 : index
    %20 = vector.load %arg8[%c0_21, %c0_22, %c0_23] : memref<1x32x8xf32, #tpu.memory_space<vmem>>, vector<1x32x8xf32>
    %21 = vector.shape_cast %20 : vector<1x32x8xf32> to vector<32x8xf32>
    %cst_24 = arith.constant dense<0.000000e+00> : vector<8x8xf32>
    %22 = tpu.matmul %5, %21, %cst_24 {dimension_numbers = #tpu.dot_dimension_numbers<[1], [0], [0], [1], [0, 0, 1, 1], [], []>} : vector<8x32xf32>, vector<32x8xf32>, vector<8x8xf32> -> vector<8x8xf32>
    %c0_25 = arith.constant 0 : index
    %c0_26 = arith.constant 0 : index
    %c0_27 = arith.constant 0 : index
    %23 = vector.load %arg11[%c0_25, %c0_26, %c0_27] : memref<1x1x8xf32, #tpu.memory_space<vmem>>, vector<1x1x8xf32>
    %24 = vector.shape_cast %23 : vector<1x1x8xf32> to vector<1x8xf32>
    %25 = vector.broadcast %24 : vector<1x8xf32> to vector<8x8xf32>
    %26 = arith.addf %22, %25 : vector<8x8xf32>
    %cst_28 = arith.constant dense<0.000000e+00> : vector<8x8xf32>
    %27 = tpu.matmul %12, %19, %cst_28 {dimension_numbers = #tpu.dot_dimension_numbers<[1], [1], [0], [0], [0, 0, 1, 0], [], []>} : vector<8x8xf32>, vector<8x8xf32>, vector<8x8xf32> -> vector<8x8xf32>
    %cst_29 = arith.constant 0.353553385 : f32
    %28 = vector.broadcast %cst_29 : f32 to vector<8x8xf32>
    %29 = arith.mulf %27, %28 : vector<8x8xf32>
    %c0_30 = arith.constant 0 : index
    %c0_31 = arith.constant 0 : index
    %c0_32 = arith.constant 0 : index
    %30 = vector.load %arg5[%c0_30, %c0_31, %c0_32] : memref<1x1x8xf32, #tpu.memory_space<vmem>>, vector<1x1x8xf32>
    %31 = vector.shape_cast %30 : vector<1x1x8xf32> to vector<1x8xf32>
    %cst_33 = arith.constant 0.000000e+00 : f32
    %32 = vector.broadcast %cst_33 : f32 to vector<1x8xf32>
    %33 = arith.cmpf ogt, %31, %32 : vector<1x8xf32>
    %cst_34 = arith.constant -1.000000e+30 : f32
    %34 = vector.shape_cast %33 : vector<1x8xi1> to vector<1x8xi1>
    %35 = vector.broadcast %34 : vector<1x8xi1> to vector<8x8xi1>
    %36 = vector.broadcast %cst_34 : f32 to vector<8x8xf32>
    %37 = arith.select %35, %29, %36 : vector<8x8xi1>, vector<8x8xf32>
    %cst_35 = arith.constant dense<0xFF800000> : vector<8xf32>
    %38 = vector.multi_reduction <maximumf>, %37, %cst_35 [1] : vector<8x8xf32> to vector<8xf32>
    %39 = vector.shape_cast %38 : vector<8xf32> to vector<8x1xf32>
    %40 = vector.broadcast %39 : vector<8x1xf32> to vector<8x8xf32>
    %41 = arith.subf %37, %40 : vector<8x8xf32>
    %42 = math.exp %41 : vector<8x8xf32>
    %cst_36 = arith.constant dense<0.000000e+00> : vector<8xf32>
    %43 = vector.multi_reduction <add>, %42, %cst_36 [1] : vector<8x8xf32> to vector<8xf32>
    %44 = vector.shape_cast %43 : vector<8xf32> to vector<8x1xf32>
    %45 = vector.broadcast %44 : vector<8x1xf32> to vector<8x8xf32>
    %46 = arith.divf %42, %45 : vector<8x8xf32>
    %cst_37 = arith.constant dense<0.000000e+00> : vector<8x8xf32>
    %47 = tpu.matmul %46, %26, %cst_37 {dimension_numbers = #tpu.dot_dimension_numbers<[1], [0], [0], [1], [0, 0, 1, 1], [], []>} : vector<8x8xf32>, vector<8x8xf32>, vector<8x8xf32> -> vector<8x8xf32>
    %c0_38 = arith.constant 0 : index
    %c0_39 = arith.constant 0 : index
    %c0_40 = arith.constant 0 : index
    %c0_41 = arith.constant 0 : index
    %48 = vector.load %arg12[%c0_38, %c0_39, %c0_40, %c0_41] : memref<1x1x8x8xf32, #tpu.memory_space<vmem>>, vector<1x1x8x8xf32>
    %49 = vector.shape_cast %48 : vector<1x1x8x8xf32> to vector<8x8xf32>
    %50 = vector.shape_cast %47 : vector<8x8xf32> to vector<1x1x8x8xf32>
    tpu.vector_store %arg12[%c0_38, %c0_39, %c0_40, %c0_41], %50 {strides = array<i32>} : memref<1x1x8x8xf32, #tpu.memory_space<vmem>>, vector<1x1x8x8xf32>,
    return
  }
  func.func @transform_0(%arg0: i32, %arg1: i32) -> (i32, i32, i32) {
    %c0_i32 = arith.constant 0 : i32
    %c0_i32_0 = arith.constant 0 : i32
    %c0_i32_1 = arith.constant 0 : i32
    return %arg0, %c0_i32, %c0_i32_0 : i32, i32, i32
  }
  func.func @transform_1(%arg0: i32, %arg1: i32) -> (i32, i32, i32) {
    %c0_i32 = arith.constant 0 : i32
    %c0_i32_0 = arith.constant 0 : i32
    %c0_i32_1 = arith.constant 0 : i32
    return %arg0, %c0_i32, %c0_i32_0 : i32, i32, i32
  }
  func.func @transform_2(%arg0: i32, %arg1: i32) -> (i32, i32, i32) {
    %c0_i32 = arith.constant 0 : i32
    %c0_i32_0 = arith.constant 0 : i32
    %c0_i32_1 = arith.constant 0 : i32
    return %arg0, %c0_i32, %c0_i32_0 : i32, i32, i32
  }
  func.func @transform_3(%arg0: i32, %arg1: i32) -> (i32, i32, i32) {
    %c0_i32 = arith.constant 0 : i32
    %c0_i32_0 = arith.constant 0 : i32
    %c0_i32_1 = arith.constant 0 : i32
    return %arg0, %c0_i32, %c0_i32_0 : i32, i32, i32
  }
  func.func @transform_4(%arg0: i32, %arg1: i32) -> (i32, i32, i32) {
    %c0_i32 = arith.constant 0 : i32
    %c0_i32_0 = arith.constant 0 : i32
    %c0_i32_1 = arith.constant 0 : i32
    return %arg1, %c0_i32, %c0_i32_0 : i32, i32, i32
  }
  func.func @transform_5(%arg0: i32, %arg1: i32) -> (i32, i32, i32) {
    %c0_i32 = arith.constant 0 : i32
    %c0_i32_0 = arith.constant 0 : i32
    %c0_i32_1 = arith.constant 0 : i32
    return %arg1, %c0_i32, %c0_i32_0 : i32, i32, i32
  }
  func.func @transform_6(%arg0: i32, %arg1: i32) -> (i32, i32, i32) {
    %c0_i32 = arith.constant 0 : i32
    %c0_i32_0 = arith.constant 0 : i32
    %c0_i32_1 = arith.constant 0 : i32
    return %arg1, %c0_i32, %c0_i32_0 : i32, i32, i32
  }
  func.func @transform_7(%arg0: i32, %arg1: i32) -> (i32, i32, i32) {
    %c0_i32 = arith.constant 0 : i32
    %c0_i32_0 = arith.constant 0 : i32
    %c0_i32_1 = arith.constant 0 : i32
    return %arg1, %c0_i32, %c0_i32_0 : i32, i32, i32
  }
  func.func @transform_8(%arg0: i32, %arg1: i32) -> (i32, i32, i32) {
    %c0_i32 = arith.constant 0 : i32
    %c0_i32_0 = arith.constant 0 : i32
    %c0_i32_1 = arith.constant 0 : i32
    return %arg1, %c0_i32, %c0_i32_0 : i32, i32, i32
  }
  func.func @transform_9(%arg0: i32, %arg1: i32) -> (i32, i32, i32) {
    %c0_i32 = arith.constant 0 : i32
    %c0_i32_0 = arith.constant 0 : i32
    %c0_i32_1 = arith.constant 0 : i32
    return %arg1, %c0_i32, %c0_i32_0 : i32, i32, i32
  }
  func.func @transform_10(%arg0: i32, %arg1: i32) -> (i32, i32, i32, i32) {
    %c0_i32 = arith.constant 0 : i32
    %c0_i32_0 = arith.constant 0 : i32
    %c0_i32_1 = arith.constant 0 : i32
    return %arg0, %arg1, %c0_i32, %c0_i32_0 : i32, i32, i32, i32
  }
}

</mosaic_0001>

<bundles_post_ra>
// kernel: tpu_custom_call.1
= control target key start
LH: loop header
LB: loop body
LE: loop exit
PB: predicated region body
PF: predicated region fallthrough
CT: control target
= control target key end

     0   :  { %s1672_s0 = inlined_call_operand.vmem [shape: f32[2,8,32], index: 0, kind: input, shape index: {}]   ;;  %s1673_s1 = inlined_call_operand.vmem [shape: f32[2,8,32], index: 1, kind: input, shape index: {}]   ;;  %s1674_s2 = inlined_call_operand.vmem [shape: f32[2,8,32], index: 2, kind: input, shape index: {}]   ;;  %s1675_s3 = inlined_call_operand.vmem [shape: f32[2,1,8], index: 3, kind: input, shape index: {}]   ;;  %s1676_s4 = inlined_call_operand.vmem [shape: f32[4,32,8], index: 4, kind: input, shape index: {}]   ;;  %s1677_s5 = inlined_call_operand.vmem [shape: f32[4,32,8], index: 5, kind: input, shape index: {}]   ;;  %s1678_s6 = inlined_call_operand.vmem [shape: f32[4,32,8], index: 6, kind: input, shape index: {}]   ;;  %s1679_s7 = inlined_call_operand.vmem [shape: f32[4,1,8], index: 7, kind: input, shape index: {}]   ;;  %s1680_s8 = inlined_call_operand.vmem [shape: f32[4,1,8], index: 8, kind: input, shape index: {}]   ;;  %s1681_s9 = inlined_call_operand.vmem [shape: f32[4,1,8], index: 9, kind: input, shape index: {}]   ;;  %s1682_s10 = inlined_call_operand.hbm [shape: f32[2,4,8,8], index: 10, kind: output, shape index: {}]  }
   0x1   :  { %1686 = sst [smem:[#allocation8_spill]] %s1676_s4 }
   0x2   :  { %1687 = sst [smem:[#allocation9_spill]] %s1677_s5 }
   0x3   :  { %15 = vsyncpa [#allocation3], 0 }
   0x4   :  { %17 = vsyncpa [#allocation3 + $0x1], 0  ;;  %s1456_s13 = smov 0   ;;  %s1458_s14 = smov 0  }
   0x5   :  { %s1460_s15 = smov 0   ;;  %s1462_s16 = smov 0  }
   0x6   :  { %s1464_s17 = smov 0   ;;  %s1466_s18 = smov 0  }
   0x7   :  { %s1468_s19 = smov 0   ;;  %s1470_s20 = smov 0  }
   0x8 LB: > { %1688 = sst [smem:[#allocation5_spill]] %s1391_s19  ;;  %s1131_s21 = sadd.s32 4294967295, %s1395_s20   ;;  %s1395_s20 = sphi %s1470_s20, %s23_s20   ;;  %s1391_s19 = sphi %s1468_s19, %s1697_s19   ;;  %s1387_s18 = sphi %s1466_s18, %s1702_s18   ;;  %s1383_s17 = sphi %s1464_s17, %s1695_s17   ;;  %s1379_s16 = sphi %s1462_s16, %s1701_s16   ;;  %s1375_s15 = sphi %s1460_s15, %s1700_s15   ;;  %s1371_s14 = sphi %s1458_s14, %s1699_s14   ;;  %s1367_s13 = sphi %s1456_s13, %s1698_s13  }
   0x9   : > { %s1132_s22 = sadd.s32 4294967294, %s1395_s20   ;;  %s32_s23 = sadd.s32 1, %s1387_s18 }
   0xa   : > { %p33_p0 = scmp.ge.s32.totalorder %s32_s23, 4  ;;  %s35_s24 = sadd.s32 1, %s1391_s19 }
   0xb   : > { %p314_p1 = scmp.ne.s32.totalorder %s1375_s15, %s1371_s14  ;;  %p315_p2 = scmp.eq.s32.totalorder %s1131_s21, 7 }
   0xc   : > { %s1704_s23 = smov (%p33_p0, %s32_s23), 0  ;;  %s1706_s24 = smov (!%p33_p0, %s35_s24), %s1391_s19 }
   0xd   : > { %1689 = sst [smem:[#allocation6_spill]] %s1704_s23  ;;  %s300_s25 = ssub.s32 %s1387_s18, %s1704_s23 }
   0xe   : > { %p1507_p3 = por %p315_p2, %p314_p1  ;;  %p37_p4 = scmp.ge.s32.totalorder %s1706_s24, 2 }
   0xf   : > { %p320_p5 = scmp.ne.s32.totalorder %s1371_s14, %s1367_s13  ;;  %p321_p6 = scmp.eq.s32.totalorder %s1132_s22, 7 }
  0x10   : > { %p1135_p7 = scmp.ge.s32.totalorder %s1395_s20, 1  ;;  %s1708_s24 = smov (%p37_p4, %s1706_s24), 0 }
  0x11   : > { %1691 = sst [smem:[#allocation7_spill]] %s1708_s24  ;;  %p1516_p8 = por %p321_p6, %p320_p5 }
  0x12   : > { %p408_p9 = scmp.lt.s32.totalorder %s1395_s20, 9  ;;  %s299_s28 = ssub.s32 %s1391_s19, %s1708_s24 }
  0x13   : > { %s304_s29 = sadd.s32 1, %s1375_s15  ;;  %s301_s30 = sor.u32 %s300_s25, %s299_s28 }
  0x14   : > { %p409_p10 = pnand %p1135_p7, %p408_p9  ;;  %p302_p11 = scmp.eq.s32.totalorder %s301_s30, 0 }
  0x15   : > { %p495_p12 = scmp.lt.s32.totalorder (!%p409_p10), %s1379_s16, 3  ;;  %p480_p13 = scmp.lt.s32.totalorder (!%p409_p10), %s1383_s17, 1 }
  0x16   : > { %s1525_s11 = scalar_select %p302_p11, %s1375_s15, %s304_s29  }
  0x17   : > { %412 = sbr.rel (%p409_p10) target bundleno = 953 (0x3b9), region = 60  ;;  %s1693_s5 = sld [smem:[#allocation9_spill]] (!%p409_p10) }
  0x18   : > { %s1694_s4 = sld [smem:[#allocation8_spill]] (!%p409_p10)  ;;  %s477_s30 = sand.u32 (!%p409_p10), 1, %s1371_s14  }
  0x1c   : > { %v1397_v0 = vmov 0.0   ;;  %s1532_s12 = scalar_select %p495_p12, %s1379_s16, 3  ;;  %vm1398_vm0 = vmmov 0   ;;  %vm533_vm1 = vcmask 261120   ;;  %vm775_vm2 = vcmask 64512  }
  0x1d   : > { %1193 = vmatprep.subr.mxu1 %v1397_v0  ;;  %1182 = vmatprep.subr.mxu0 %v1397_v0  ;;  %s1539_s21 = scalar_select %p480_p13, %s1383_s17, 1  ;;  %v856_v24 = vlaneseq  ;;  %v1399_v28 = vmov 0  }
  0x1e   : > { %1201 = vmatprep.mubr.msk.f32.mxu1 %vm1398_vm0, %v1397_v0  ;;  %1190 = vmatprep.mubr.msk.f32.mxu0 %vm1398_vm0, %v1397_v0  ;;  %s1542_s22 = sshll.u32 %s1532_s12, 5  ;;  %s512_s28 = scalar_lea.vmem %s1679_s7, %s1532_s12 }
  0x1f   : > { %s504_s29 = scalar_lea.vmem %s1693_s5, %s1542_s22  ;;  %s499_s23 = scalar_lea.vmem %s1694_s4, %s1542_s22  ;;  %v1146_v12 = vld [vmem:[%s512_s28] ss:$0 sm:$0xff]  ;;  %v857_v26 = vshrl.u32 %v856_v24, 7 }
  0x20   : > { %v610_v1 = vld [vmem:[%s504_s29 + $0x18] sm:$0xff]  ;;  %v609_v3 = vld [vmem:[%s504_s29 + $0x10] sm:$0xff]  ;;  %s1553_s19 = sshll.u32 %s1539_s21, 3  ;;  %v608_v5 = vld [vmem:[%s504_s29 + $0x8] sm:$0xff]  ;;  %s509_s4 = scalar_lea.vmem %s1678_s6, %s1542_s22 }
  0x21   : > { %v525_v2 = vld [vmem:[%s499_s23 + $0x18] sm:$0xff]  ;;  %1194 = vmatpush3.msra.mxu1 %v610_v1  ;;  %v524_v4 = vld [vmem:[%s499_s23 + $0x10] sm:$0xff]  ;;  %v523_v6 = vld [vmem:[%s499_s23 + $0x8] sm:$0xff]  ;;  %s487_s24 = scalar_lea.vmem %s1673_s1, %s1553_s19  ;;  %s483_s5 = scalar_lea.vmem %s1672_s0, %s1553_s19  ;;  %v858_v27 = vsub.s32 0, %v857_v26 }
  0x22   : > { %1183 = vmatpush3.msra.mxu0 %v525_v2  ;;  %1195 = vmatprep.subr.mxu1 %v1397_v0  ;;  %v607_v7 = vld [vmem:[%s504_s29] sm:$0xff]  ;;  %v694_v19 = vld [vmem:[%s509_s4 + $0x18] sm:$0xff]  ;;  %v693_v20 = vld [vmem:[%s509_s4 + $0x10] sm:$0xff]  ;;  %s491_s29 = scalar_lea.vmem %s1674_s2, %s1553_s19  ;;  %s494_s28 = scalar_lea.vmem %s1675_s3, %s1539_s21 }
  0x23   : > { %1184 = vmatprep.subr.mxu0 %v1397_v0  ;;  %1196 = vmatpush3.msra.mxu1 %v609_v3  ;;  %v522_v8 = vld [vmem:[%s499_s23] sm:$0xff]  ;;  %s515_s23 = scalar_lea.vmem %s1680_s8, %s1532_s12  ;;  %v692_v21 = vld [vmem:[%s509_s4 + $0x8] sm:$0xff]  ;;  %s948_s21 = scalar_lea.sflag [#allocation3], %s477_s30 }
  0x24   : > { %1185 = vmatpush3.msra.mxu0 %v524_v4  ;;  %1197 = vmatprep.subr.mxu1 %v1397_v0  ;;  %v520_v9 = vld [vmem:[%s487_s24] sm:$0xff]  ;;  %s518_s24 = scalar_lea.vmem %s1681_s9, %s1532_s12 }
  0x25   : > { %1186 = vmatprep.subr.mxu0 %v1397_v0  ;;  %1198 = vmatpush3.msra.mxu1 %v608_v5  ;;  %v519_v10 = vld [vmem:[%s483_s5] sm:$0xff]  ;;  %s1156_s5 = sshll.u32 %s1383_s17, 2 }
  0x26   : > { %1187 = vmatpush3.msra.mxu0 %v523_v6  ;;  %1199 = vmatprep.subr.mxu1 %v1397_v0  ;;  %v1148_v11 = vld [vmem:[%s515_s23] ss:$0 sm:$0xff]  ;;  %s959_s23 = sadd.s32 %s1379_s16, %s1156_s5  ;;  %s1400_s16 = smov [#allocation2]  }
  0x27   : > { %1188 = vmatprep.subr.mxu0 %v1397_v0  ;;  %1200 = vmatpush3.msra.mxu1 %v607_v7  ;;  %v691_v22 = vld [vmem:[%s509_s4] sm:$0xff]  ;;  %s1136_s4 = sshll.u32 %s477_s30, 3 }
  0x28   : > { %1189 = vmatpush3.msra.mxu0 %v522_v8  ;;  %1202 = vmatmul.mubr.msk.f32.vlgmr.msra.gmra.mxu1 %vm533_vm1, %v520_v9  ;;  %v521_v23 = vld [vmem:[%s491_s29] sm:$0xff]  ;;  %s1157_s29 = sshll.u32 %s959_s23, 7  ;;  %s479_s22 = scalar_lea.vmem [#allocation2], %s1136_s4 }
  0x29   : > { %1191 = vmatmul.mubr.msk.f32.vlgmr.msra.gmra.mxu0 %vm533_vm1, %v519_v10  ;;  %1215 = vmatprep.subr.mxu1 %v1397_v0  ;;  %v853_v25 = vld [vmem:[%s494_s28] sm:$0x1]  ;;  %s963_s25 = sshll.u32 %s479_s22, 4  ;;  %s1619_s19 = scalar_lea.hbm %s1682_s10, %s1157_s29  ;;  %s1621_s25 = int_to_ptr.vmem [resolvable:$true] %s963_s25 }
  0x2a   : > { %1217 = vmatprep.mubr.msk.f32.mxu1 %vm1398_vm0, %v1397_v0  ;;  %1204 = vmatprep.subr.mxu0 %v1397_v0  ;;  %vm854_vm3 = vcmp.gt.f32.partialorder %v853_v25, 0.0  ;;  %v1150_v42 = vld [vmem:[%s518_s24] ss:$0 sm:$0xff]  ;;  %s1303_s17 = scalar_lea.vmem %s1621_s25, 128  ;;  %s1307_s24 = sshll.u32 %s1400_s16, 4  ;;  %s1308_s24 = int_to_ptr.vmem [resolvable:$false] %s1307_s24 }
  0x2b   : > { %1212 = vmatprep.mubr.msk.f32.mxu0 %vm1398_vm0, %v1397_v0  ;;  %1205 = vmatpush3.msra.mxu0 %v694_v19  ;;  %v855_v29 = vsel %vm854_vm3, 1, %v1399_v28  ;;  %p1304_p0 = scmp.ne.s32.totalorder %s1621_s25, %s1303_s17  ;;  %s1309_s4 = scalar_lea.vmem %s1308_s24, 256 }
  0x2c   : > { %1206 = vmatprep.subr.mxu0 %v1397_v0  ;;  %v859_v30 = vrot.slane %v855_v29, %v858_v27  ;;  %p1310_p4 = scmp.lt.s32.totalorder %s1621_s25, %s1308_s24  ;;  %p1311_p5 = scmp.lt.s32.totalorder %s1309_s4, %s1303_s17 }
  0x2d   : > { %1207 = vmatpush3.msra.mxu0 %v693_v20  ;;  %p1305_p1 = pnand %p1304_p0, %p1507_p3 }
  0x2e   : > { %1208 = vmatprep.subr.mxu0 %v1397_v0  ;;  %vm860_vm4 = vcmp.eq.s32.totalorder %v859_v30, 1  ;;  %p1312_p6 = por %p1311_p5, %p1310_p4 }
  0x2f   : > { %1209 = vmatpush3.msra.mxu0 %v692_v21  ;;  %p1306_p2 = pneg %p1305_p1 }
  0x30   : > { %1210 = vmatprep.subr.mxu0 %v1397_v0 }
  0x31   : > { %1211 = vmatpush3.msra.mxu0 %v691_v22  ;;  %p1313_p7 = pnand %p1312_p6, %p1306_p2 }
  0x32   : > { %1213 = vmatmul.mubr.msk.f32.vlgmr.msra.gmra.mxu0 %vm533_vm1, %v521_v23 }
  0xe8   : > { %v687_v13 = vpop.f32.mrf.mxu1 }
  0xe9   : > { %v603_v14 = vpop.f32.mrf.mxu0  ;;  %v688_v15 = vadd.f32 %v1148_v11, %v687_v13 }
  0xea   : > { %v604_v16 = vadd.f32 %v1146_v12, %v603_v14  ;;  %v1203_v17 = vpop.f32.mrf.mxu1 }
  0xeb   : > { %v1192_v18 = vpop.f32.mrf.mxu0  ;;  %1216 = vmatpush3.xpose.msk.msra.mxu1 %vm775_vm2, %v688_v15 }
  0xec   : > { %1220 = vmatprep.subr.mxu1 %v1397_v0 }
  0xee   : > { %1218 = vmatmul.mubr.msk.f32.vlgmr.msra.gmra.mxu1 %vm775_vm2, %v604_v16 }
  0xef   : > { %1222 = vmatprep.mubr.msk.f32.mxu1 %vm1398_vm0, %v1397_v0 }
  0xf2   : > { %v771_v41 = vpop.f32.mrf.mxu0 }
  0xf3   : > { %v772_v43 = vadd.f32 %v1150_v42, %v771_v41 }
  0xf4   : > { %v1214_v44 = vpop.f32.mrf.mxu0 }
  0xf5   : > { %1221 = vmatpush3.msra.mxu1 %v772_v43 }
 0x1ae   : > { %v848_v31 = vpop.f32.mrf.mxu1 }
 0x1af   : > { %v852_v32 = vmul.f32 0.35355338, %v848_v31 }
 0x1b0   : > { %v1219_v33 = vpop.f32.mrf.mxu1 }
 0x1b1   : > { %v861_v34 = vsel %vm860_vm4, %v852_v32, -1e+30 }
 0x1b2   : > { %v862_v35 = vsel %vm775_vm2, %v861_v34, -inf }
 0x1b3   : > { %863 = vmax.xlane.f32.xlu0 %v862_v35 }
 0x23c   : > { %v864_v36 = vpop.xlane.xlu0 %863 }
 0x23d   : > { %v865_v37 = vsub.f32 %v861_v34, %v864_v36 }
 0x23f   : > { %v866_v38 = vmul.f32 1.442695, %v865_v37 }
 0x241   : > { %1299 = vpow2.f32 %v866_v38 }
 0x24e   : > { %v1300_v39 = vpop.eup %1299 }
 0x24f   : > { %v868_v40 = vsel %vm775_vm2, %v1300_v39, 0.0 }
 0x250   : > { %869 = vadd.xlane.f32.xlu0 %v868_v40 }
 0x2d9   : > { %v870_v45 = vpop.xlane.xlu0 %869 }
 0x2da   : > { %1301 = vrcp.f32 %v870_v45 }
 0x2e7   : > { %v1302_v46 = vpop.eup %1301 }
 0x2e8   : > { %v872_v47 = vmul.f32 %v1302_v46, %v1300_v39 }
 0x2ea   : > { %1223 = vmatmul.mubr.msk.f32.vlgmr.msra.gmra.mxu1 %vm775_vm2, %v872_v47 }
 0x3aa   : > { %v942_v48 = vpop.f32.mrf.mxu1 }
 0x3ab   : > { %946 = vst.msk [vmem:[%s479_s22] sm:$0xff] %vm775_vm2, %v942_v48 }
 0x3ac   : > { %v1224_v49 = vpop.f32.mrf.mxu1 }
 0x3ad   : > { %1316 = shalt.err (!%p1313_p7)
}
 0x3ae   : > { %s1317_s5 = scalar_lea.hbm %s1619_s19, 128  ;;  %s1321_s29 = scalar_lea.hbm %s1682_s10, 1024 }
 0x3af   : > { %p1318_p9 = scmp.ne.s32.totalorder %s1619_s19, %s1317_s5  ;;  %p1322_p12 = scmp.lt.s32.totalorder %s1619_s19, %s1682_s10 }
 0x3b0   : > { %p1323_p13 = scmp.lt.s32.totalorder %s1321_s29, %s1317_s5 }
 0x3b1   : > { %p1319_p10 = pnand %p1318_p9, %p1507_p3 }
 0x3b2   : > { %p1324_p0 = por %p1323_p13, %p1322_p12 }
 0x3b3   : > { %p1320_p11 = pneg %p1319_p10 }
 0x3b5   : > { %p1325_p1 = pnand %p1324_p0, %p1320_p11 }
 0x3b7   : > { %1328 = shalt.err (!%p1325_p1)
}
 0x3b8   : > { %1225 = dma.vmem_to_hbm [thread:$0]  (%p1507_p3), %s1621_s25, 128, %s1619_s19, %s948_s21  }
 0x3b9 PF: > { %p1231_p2 = scmp.ge.s32.totalorder %s1395_s20, 2  ;;  %s975_s28 = sand.u32 1, %s1367_s13  }
 0x3ba   : > { %s976_s17 = scalar_lea.sflag [#allocation3], %s975_s28 }
 0x3bb   : > { %p1228_p4 = pnand %p1231_p2, %p1516_p8 }
 0x3bd   : > { %p1229_p5 = pneg %p1228_p4 }
 0x3bf   : > { %1362 = dma.done.wait (%p1229_p5), %s976_s17, 128  }
 0x3c0   : > { %1364 = vsyncadd (%p1229_p5), %s976_s17, 4294967168  ;;  %s23_s20 = sadd.s32 1, %s1395_s20   ;;  %s1695_s17 = sld [smem:[#allocation5_spill]] }
 0x3c1   : > { %p20_p6 = scmp.ge.s32.totalorder %s23_s20, 10   ;;  %s1696_s26 = sld [smem:[#allocation6_spill]] }
 0x3c2   : > { %s1697_s19 = sld [smem:[#allocation7_spill]]  ;;  %s1698_s13 = smov %s1371_s14 }
 0x3c3   : > { %s1699_s14 = smov %s1375_s15  ;;  %s1700_s15 = smov %s1525_s11 }
 0x3c4   : > { %s1701_s16 = smov %s1387_s18  ;;  %22 = sbr.rel (!%p20_p6) target bundleno = 8 (0x8), region = 122 }
 0x3c7   : > { %s1702_s18 = smov %s1696_s26 }
 0x3c9   :  { %981 = vsyncpa [#allocation3], 1 }
 0x3ca   :  { %983 = vsyncpa [#allocation3 + $0x1], 1 }

</bundles_post_ra>
